<compile_context>
chip_gen: v5e
topology: v5e:2x2
jax: 0.10.0
libtpu: 0.0.40
codegen_flags: <defaults>
</compile_context>

<pallas_src>
import functools
import math

import jax
import jax.numpy as jnp
from jax.experimental import pallas as pl
from jax.experimental.pallas import tpu as pltpu


def _cdiv(a, b):
    return -(-a // b)


_TL_CANDIDATES = (2048, 1536, 1024, 768, 512, 384, 256, 128)


def _vmem_capacity_bytes():
    try:
        return int(pltpu.get_tpu_info().vmem_capacity_bytes)
    except Exception:
        return 64 * 1024 * 1024       # conservative default (v7x per-core VMEM)


def _pick_tl(l_out, n_batch, bytes_per_col, budget):
    """Pick the L tile: largest tile fitting the VMEM budget with low padding
    waste and enough grid steps for megacore sharding + double buffering."""
    if l_out <= 128:
        return l_out                  # full-dim block (exempt from 128 rule)
    # l_out itself is allowed (single full-dim tile, zero waste); all other
    # candidates are multiples of 128 so lane stores stay dense.
    cands = (l_out,) + tuple(t for t in _TL_CANDIDATES if t < l_out)
    fits = [t for t in cands if t * bytes_per_col <= budget]
    if not fits:
        return 128

    def waste(t):
        return (_cdiv(l_out, t) * t - l_out) / l_out

    for max_waste, min_steps in ((0.125, 4), (0.25, 4), (0.5, 2), (10.0, 1)):
        for t in fits:                                   # descending size
            if waste(t) <= max_waste and n_batch * _cdiv(l_out, t) >= min_steps:
                return t
    return fits[-1]


# ----------------------------- Pallas kernel --------------------------------

def _conv1d_kernel(x_ref, w_ref, o_ref, *, taps, tl, relu):
    # x_ref: (1, 1, CK, tl [+ taps - 1])  activation tile / halo window
    # w_ref: (taps, Cout, CK) bf16 -- constant block index, stays VMEM-resident
    # o_ref: (1, Cout, tl) in the output dtype (x.dtype)
    xw = x_ref[0, 0].astype(jnp.bfloat16)
    acc = jnp.dot(w_ref[0], xw[:, 0:tl], preferred_element_type=jnp.float32)
    for t in range(1, taps):                              # static K-tap loop
        acc = acc + jnp.dot(w_ref[t], xw[:, t:t + tl],
                            preferred_element_type=jnp.float32)
    if relu:
        acc = jnp.maximum(acc, 0.0)
    o_ref[0] = acc.astype(o_ref.dtype)


def _conv1d_pallas(xw, w_taps, l_out, tl, relu, out_dtype, windowed):
    """xw: (N, G, CK, W) activation; w_taps: (taps, Cout, CK) bf16."""
    N, G, CK, W = xw.shape
    taps, Cout, _ = w_taps.shape
    l_tiles = _cdiv(l_out, tl)

    if windowed:
        # One halo window (full W = tl + taps - 1 columns) per (n, l) step.
        x_spec = pl.BlockSpec((1, 1, CK, W), lambda n, l: (n, l, 0, 0))
    else:
        # Plain L tiling; the last tile may be ragged (cdiv grid).
        x_spec = pl.BlockSpec((1, 1, CK, tl), lambda n, l: (n, 0, 0, l))
    # Weight block index is constant -> DMA'd once and reused every step.
    # TODO(synk): pipeline_mode=pl.Buffered(1) would drop its second (tiny)
    # pipeline buffer; left at the default for portability.
    w_spec = pl.BlockSpec((taps, Cout, CK), lambda n, l: (0, 0, 0))
    o_spec = pl.BlockSpec((1, Cout, tl), lambda n, l: (n, 0, l))

    out_isz = jnp.dtype(out_dtype).itemsize
    flops = 2 * N * Cout * CK * taps * l_tiles * tl
    bytes_accessed = int(xw.size * xw.dtype.itemsize + w_taps.size * 2
                         + N * Cout * l_out * out_isz)
    vmem_limit = min(_vmem_capacity_bytes() * 3 // 4, 96 * 1024 * 1024)

    kernel = functools.partial(_conv1d_kernel, taps=taps, tl=tl, relu=relu)
    return pl.pallas_call(
        kernel,
        out_shape=jax.ShapeDtypeStruct((N, Cout, l_out), out_dtype),
        grid_spec=pltpu.PrefetchScalarGridSpec(
            num_scalar_prefetch=0,
            grid=(N, l_tiles),
            in_specs=[x_spec, w_spec],
            out_specs=o_spec,
        ),
        compiler_params=pltpu.CompilerParams(
            dimension_semantics=("parallel", "parallel"),
            vmem_limit_bytes=vmem_limit,
        ),
        cost_estimate=pl.CostEstimate(
            flops=flops, transcendentals=0, bytes_accessed=bytes_accessed),
    )(xw, w_taps)


# ------------------------------ Module glue ---------------------------------

@functools.partial(jax.jit,
                   static_argnames=("kernel_size", "stride", "padding", "relu"))
def conv1d_forward(x, weight, *, kernel_size, stride, padding, relu):
    N, C, L = x.shape
    Cout = weight.shape[0]
    K = kernel_size
    l_out = (L + 2 * padding - K) // stride + 1
    assert l_out >= 1, "empty conv output"
    out_dtype = x.dtype
    out_isz = jnp.dtype(out_dtype).itemsize
    budget = _vmem_capacity_bytes() // 4          # pipeline-buffer budget

    if K == 1 and stride == 1 and padding == 0:
        # Pointwise conv: zero wrapper passes; bf16 cast happens in-kernel.
        tl = _pick_tl(l_out, N,
                      2 * (C * x.dtype.itemsize + Cout * out_isz), budget)
        xw = x.reshape(N, 1, C, L)
        w_taps = weight.reshape(1, Cout, C).astype(jnp.bfloat16)
        return _conv1d_pallas(xw, w_taps, l_out, tl, relu, out_dtype,
                              windowed=False)

    if stride == 1:
        # In-kernel K-tap reduction over per-tile halo windows: only K-1
        # duplicated columns per tile instead of the K x im2col inflation.
        tl = _pick_tl(l_out, N, 2 * (2 * C + Cout * out_isz), budget)
        l_tiles = _cdiv(l_out, tl)
        need = l_tiles * tl + K - 1               # conv pad + tile coverage
        xp = jnp.pad(x, ((0, 0), (0, 0), (padding, need - L - padding)))
        xp = xp.astype(jnp.bfloat16)
        xw = jnp.stack([xp[:, :, i * tl: i * tl + tl + K - 1]
                        for i in range(l_tiles)], axis=1)   # (N,Lt,C,tl+K-1)
        w_taps = jnp.transpose(weight, (2, 0, 1)).astype(jnp.bfloat16)
        return _conv1d_pallas(xw, w_taps, l_out, tl, relu, out_dtype,
                              windowed=True)

    # TODO(synk): strided conv still goes through an im2col (K x activation
    # inflation); an in-kernel strided-tap reduction would remove that traffic.
    CK = C * K
    tl = _pick_tl(l_out, N, 2 * (2 * CK + Cout * out_isz), budget)
    xp = jnp.pad(x, ((0, 0), (0, 0), (padding, padding))) if padding else x
    patches = jnp.stack([xp[:, :, t:t + stride * l_out:stride]
                         for t in range(K)], axis=2)        # (N, C, K, Lout)
    x_col = patches.reshape(N, 1, CK, l_out).astype(jnp.bfloat16)
    w_taps = weight.reshape(1, Cout, CK).astype(jnp.bfloat16)
    return _conv1d_pallas(x_col, w_taps, l_out, tl, relu, out_dtype,
                          windowed=False)


class InitializedConv1d:
    """JAX/Pallas port of Initialized_Conv1d (groups=1, bias=False path)."""

    def __init__(self, in_channels, out_channels, kernel_size=1, stride=1,
                 padding=0, groups=1, relu=False, bias=False, *, key):
        assert groups == 1, "only groups=1 supported"
        # TODO(synk): grouped / depthwise conv path not implemented.
        assert bias is False, "bias=False path only (matches module default)"
        self.k = kernel_size
        self.stride = stride
        self.padding = padding
        self.relu = relu

        # Deterministic weight init mirroring nn.init on shape (Cout, Cin, K).
        fan_in = in_channels * kernel_size
        fan_out = out_channels * kernel_size
        shape = (out_channels, in_channels, kernel_size)
        if relu:
            std = math.sqrt(2.0 / fan_in)                 # kaiming_normal_, relu
            w = std * jax.random.normal(key, shape, dtype=jnp.float32)
        else:
            bound = math.sqrt(6.0 / (fan_in + fan_out))   # xavier_uniform_
            w = jax.random.uniform(key, shape, dtype=jnp.float32,
                                   minval=-bound, maxval=bound)
        self.weight = w  # (Cout, Cin, K), kept in f32; bf16 cast at MXU feed

    def __call__(self, x):
        return conv1d_forward(x, self.weight, kernel_size=self.k,
                              stride=self.stride, padding=self.padding,
                              relu=self.relu)


# --------------------------------- Demo --------------------------------------

if __name__ == "__main__":
    key = jax.random.PRNGKey(0)
    k_w1, k_w2, k_w3, k_x1, k_x2, k_x3 = jax.random.split(key, 6)

    # Test 1: pointwise conv with ReLU (module default kernel_size=1) -> the
    # zero-copy direct path.
    N, C_in, C_out, L = 2, 4, 8, 16
    x = jax.random.normal(k_x1, (N, C_in, L), dtype=jnp.float32)
    conv = InitializedConv1d(C_in, C_out, kernel_size=1, relu=True, key=k_w1)
    out = jax.block_until_ready(conv(x))

    w32 = conv.weight.reshape(C_out, C_in).astype(jnp.bfloat16).astype(jnp.float32)
    x32 = x.astype(jnp.bfloat16).astype(jnp.float32)
    ref = jnp.maximum(jnp.einsum("oc,ncl->nol", w32, x32), 0.0)
    assert out.shape == (N, C_out, L)
    assert jnp.allclose(out, ref, atol=2e-3, rtol=2e-3)

    # Test 2: K=3 conv with padding, xavier init (no relu) -> the in-kernel
    # K-tap halo-window path.
    N2, Ci2, Co2, K2, L2 = 2, 16, 24, 3, 50
    x2 = jax.random.normal(k_x2, (N2, Ci2, L2), dtype=jnp.float32)
    conv2 = InitializedConv1d(Ci2, Co2, kernel_size=K2, stride=1, padding=1,
                              relu=False, key=k_w2)
    out2 = jax.block_until_ready(conv2(x2))

    w2_32 = conv2.weight.astype(jnp.bfloat16).astype(jnp.float32)
    x2_32 = x2.astype(jnp.bfloat16).astype(jnp.float32)
    ref2 = jax.lax.conv_general_dilated(
        x2_32, w2_32, window_strides=(1,), padding=[(1, 1)],
        dimension_numbers=("NCH", "OIH", "NCH"))
    assert out2.shape == (N2, Co2, L2)
    assert jnp.allclose(out2, ref2, atol=5e-3, rtol=5e-3)

    # Test 3: strided conv (stride=2, K=3, padding=1, relu) -> im2col fallback.
    N3, Ci3, Co3, K3, L3 = 2, 8, 8, 3, 33
    x3 = jax.random.normal(k_x3, (N3, Ci3, L3), dtype=jnp.float32)
    conv3 = InitializedConv1d(Ci3, Co3, kernel_size=K3, stride=2, padding=1,
                              relu=True, key=k_w3)
    out3 = jax.block_until_ready(conv3(x3))

    w3_32 = conv3.weight.astype(jnp.bfloat16).astype(jnp.float32)
    x3_32 = x3.astype(jnp.bfloat16).astype(jnp.float32)
    ref3 = jnp.maximum(jax.lax.conv_general_dilated(
        x3_32, w3_32, window_strides=(2,), padding=[(1, 1)],
        dimension_numbers=("NCH", "OIH", "NCH")), 0.0)
    assert out3.shape == (N3, Co3, (L3 + 2 - K3) // 2 + 1)
    assert jnp.allclose(out3, ref3, atol=5e-3, rtol=5e-3)

    print("KERNEL_OK")
</pallas_src>

<mosaic_0001>
module attributes {stable_mosaic.version = 11 : i64} {
  func.func @_conv1d_kernel(%arg0: i32, %arg1: i32, %arg2: memref<1x1x4x16xf32, #tpu.memory_space<vmem>>, %arg3: memref<1x8x4xbf16, #tpu.memory_space<vmem>>, %arg4: memref<1x8x16xf32, #tpu.memory_space<vmem>>) attributes {dimension_semantics = [#tpu.dimension_semantics<parallel>, #tpu.dimension_semantics<parallel>], iteration_bounds = array<i64: 2, 1>, scalar_prefetch = 0 : i64, scratch_operands = 0 : i64, tpu.core_type = #tpu.core_type<tc>, window_params = [{transform_indices = @transform_0, window_bounds = array<i64: 1, 1, 4, 16>}, {pipeline_mode = #tpu.pipeline_mode<synchronous>, transform_indices = @transform_1, window_bounds = array<i64: 1, 8, 4>}, {transform_indices = @transform_2, window_bounds = array<i64: 1, 8, 16>}]} {
    %c0 = arith.constant 0 : index
    %c0_0 = arith.constant 0 : index
    %c0_1 = arith.constant 0 : index
    %c0_2 = arith.constant 0 : index
    %0 = vector.load %arg2[%c0, %c0_0, %c0_1, %c0_2] : memref<1x1x4x16xf32, #tpu.memory_space<vmem>>, vector<1x1x4x16xf32>
    %1 = vector.shape_cast %0 : vector<1x1x4x16xf32> to vector<4x16xf32>
    %2 = arith.truncf %1 : vector<4x16xf32> to vector<4x16xbf16>
    %c0_3 = arith.constant 0 : index
    %c0_4 = arith.constant 0 : index
    %c0_5 = arith.constant 0 : index
    %3 = vector.load %arg3[%c0_3, %c0_4, %c0_5] : memref<1x8x4xbf16, #tpu.memory_space<vmem>>, vector<1x8x4xbf16>
    %4 = vector.shape_cast %3 : vector<1x8x4xbf16> to vector<8x4xbf16>
    %cst = arith.constant dense<0.000000e+00> : vector<8x16xf32>
    %5 = tpu.matmul %4, %2, %cst {dimension_numbers = #tpu.dot_dimension_numbers<[1], [0], [0], [1], [0, 0, 1, 1], [], []>} : vector<8x4xbf16>, vector<4x16xbf16>, vector<8x16xf32> -> vector<8x16xf32>
    %cst_6 = arith.constant 0.000000e+00 : f32
    %6 = vector.broadcast %cst_6 : f32 to vector<8x16xf32>
    %7 = arith.maximumf %5, %6 : vector<8x16xf32>
    %c0_7 = arith.constant 0 : index
    %c0_8 = arith.constant 0 : index
    %c0_9 = arith.constant 0 : index
    %8 = vector.load %arg4[%c0_7, %c0_8, %c0_9] : memref<1x8x16xf32, #tpu.memory_space<vmem>>, vector<1x8x16xf32>
    %9 = vector.shape_cast %8 : vector<1x8x16xf32> to vector<8x16xf32>
    %10 = vector.shape_cast %7 : vector<8x16xf32> to vector<1x8x16xf32>
    tpu.vector_store %arg4[%c0_7, %c0_8, %c0_9], %10 {strides = array<i32>} : memref<1x8x16xf32, #tpu.memory_space<vmem>>, vector<1x8x16xf32>,
    return
  }
  func.func @transform_0(%arg0: i32, %arg1: i32) -> (i32, i32, i32, i32) {
    %c0_i32 = arith.constant 0 : i32
    %c0_i32_0 = arith.constant 0 : i32
    %c0_i32_1 = arith.constant 0 : i32
    return %arg0, %c0_i32, %c0_i32_0, %arg1 : i32, i32, i32, i32
  }
  func.func @transform_1(%arg0: i32, %arg1: i32) -> (i32, i32, i32) {
    %c0_i32 = arith.constant 0 : i32
    %c0_i32_0 = arith.constant 0 : i32
    %c0_i32_1 = arith.constant 0 : i32
    %c0_i32_2 = arith.constant 0 : i32
    return %c0_i32, %c0_i32_0, %c0_i32_1 : i32, i32, i32
  }
  func.func @transform_2(%arg0: i32, %arg1: i32) -> (i32, i32, i32) {
    %c0_i32 = arith.constant 0 : i32
    %c0_i32_0 = arith.constant 0 : i32
    return %arg0, %c0_i32, %arg1 : i32, i32, i32
  }
}

</mosaic_0001>

<bundles_post_ra>
// kernel: conv1d_forward.1
= control target key start
LH: loop header
LB: loop body
LE: loop exit
PB: predicated region body
PF: predicated region fallthrough
CT: control target
= control target key end

     0   :  { %7 = vsyncpa [#allocation3], 0  ;;  %s542_s0 = inlined_call_operand.vmem [shape: f32[2,1,4,16], index: 0, kind: input, shape index: {}]   ;;  %s543_s1 = inlined_call_operand.vmem [shape: bf16[1,8,4], index: 1, kind: input, shape index: {}]   ;;  %s544_s2 = inlined_call_operand.hbm [shape: f32[2,8,16], index: 2, kind: output, shape index: {}]  }
   0x1   :  { %9 = vsyncpa [#allocation3 + $0x1], 0  ;;  %s442_s9 = smov 0   ;;  %s444_s10 = smov 0  }
   0x2   :  { %s446_s11 = smov 0   ;;  %s448_s12 = smov 0  }
   0x3   :  { %s450_s13 = smov 0   ;;  %s452_s14 = smov 0  }
   0x4 LB: > { %s280_s15 = sadd.s32 4294967295, %s425_s14   ;;  %s281_s16 = sadd.s32 4294967294, %s425_s14   ;;  %s425_s14 = sphi %s452_s14, %s15_s14   ;;  %s421_s13 = sphi %s450_s13, %s551_s13   ;;  %s417_s12 = sphi %s448_s12, %s550_s12   ;;  %s413_s11 = sphi %s446_s11, %s549_s11   ;;  %s409_s10 = sphi %s444_s10, %s548_s10   ;;  %s405_s9 = sphi %s442_s9, %s547_s9  }
   0x5   : > { %s27_s17 = sadd.s32 1, %s421_s13  ;;  %s85_s18 = sadd.s32 1, %s413_s11 }
   0x6   : > { %p29_p0 = scmp.ge.s32.totalorder %s27_s17, 2  ;;  %p95_p1 = scmp.ne.s32.totalorder %s413_s11, %s409_s10 }
   0x7   : > { %p96_p2 = scmp.eq.s32.totalorder %s280_s15, 1  ;;  %p101_p3 = scmp.ne.s32.totalorder %s409_s10, %s405_s9 }
   0x8   : > { %s553_s17 = smov (%p29_p0, %s27_s17), 0  ;;  %p102_p5 = scmp.eq.s32.totalorder %s281_s16, 1 }
   0x9   : > { %p482_p4 = por %p96_p2, %p95_p1  ;;  %s80_s20 = ssub.s32 %s421_s13, %s553_s17 }
   0xa   : > { %p284_p6 = scmp.ge.s32.totalorder %s425_s14, 1  ;;  %p83_p7 = scmp.eq.s32.totalorder %s80_s20, 0 }
   0xb   : > { %p489_p8 = por %p102_p5, %p101_p3  ;;  %p133_p9 = scmp.lt.s32.totalorder %s425_s14, 3 }
   0xc   : > { %s495_s22 = scalar_select %p83_p7, %s413_s11, %s85_s18  }
   0xd   : > { %p134_p10 = pnand %p284_p6, %p133_p9 }
   0xe   : > { %p157_p11 = scmp.lt.s32.totalorder (!%p134_p10), %s417_s12, 1  ;;  %s154_s30 = sand.u32 (!%p134_p10), 1, %s409_s10  }
   0xf   : > { %137 = sbr.rel (%p134_p10) target bundleno = 165 (0xa5), region = 28  ;;  %s289_s3 = sshll.u32 (!%p134_p10), %s417_s12, 3 }
  0x10   : > { %s285_s4 = sshll.u32 (!%p134_p10), %s154_s30, 3  ;;  %s204_s7 = scalar_lea.hbm (!%p134_p10), %s544_s2, %s289_s3 }
  0x11   : > { %s156_s8 = scalar_lea.vmem (!%p134_p10), [#allocation2], %s285_s4  ;;  %s208_s16 = sshll.u32 (!%p134_p10), %s204_s7, 4  ;;  %s209_s16 = int_to_ptr.hbm [resolvable:$true] %s208_s16 }
  0x12   : > { %s206_s15 = sshll.u32 (!%p134_p10), %s156_s8, 4  ;;  %s193_s18 = scalar_lea.sflag (!%p134_p10), [#allocation3], %s154_s30  ;;  %s207_s15 = int_to_ptr.vmem [resolvable:$true] %s206_s15 }
  0x13   : > { %s361_s20 = sshra.s32 (!%p134_p10), %s209_s16, 4  ;;  %s367_s25 = scalar_lea.hbm (!%p134_p10), %s544_s2, 16  ;;  %s362_s20 = int_to_ptr.hbm [resolvable:$true] %s361_s20 }
  0x14   : > { %s158_s23 = scalar_select %p157_p11, %s417_s12, 1  ;;  %vm172_vm0 = vcmask 1041408   ;;  %v167_v3 = vld [vmem:[%s543_s1] sm:$0xf]  ;;  %vm168_vm1 = vcmask 31744   ;;  %vm190_vm2 = vcmask 130048  }
  0x15   : > { %p368_p1 = scmp.lt.s32.totalorder %s362_s20, %s544_s2 }
  0x16   : > { %s286_s24 = sshll.u32 %s158_s23, 2  ;;  %s363_s23 = scalar_lea.hbm %s362_s20, 8 }
  0x17   : > { %s163_s27 = scalar_lea.vmem %s542_s0, %s286_s24  ;;  %p364_p12 = scmp.ne.s32.totalorder %s362_s20, %s363_s23 }
  0x18   : > { %v165_v0 = vld [vmem:[%s163_s27] sm:$0xf]  ;;  %p369_p2 = scmp.lt.s32.totalorder %s367_s25, %s363_s23 }
  0x19   : > { %v166_v1 = vpack.c.bf16 %v165_v0, %v165_v0  ;;  %p365_p13 = pnand %p364_p12, %p482_p4 }
  0x1a   : > { %p370_p3 = por %p369_p2, %p368_p1 }
  0x1b   : > { %v174_v2 = vsel %vm172_vm0, %v166_v1, 0  ;;  %p366_p0 = pneg %p365_p13 }
  0x1c   : > { %183 = vmatpush.bf16.msra.mxu0 %v174_v2 }
  0x1d   : > { %p371_p5 = pnand %p370_p3, %p366_p0 }
  0x1f   : > { %287 = vmatmul.msk.bf16.vlgmr.msra.gmra.mxu0 %vm168_vm1, %v167_v3 }
  0x9c   : > { %v185_v4 = vpop.f32.mrf.mxu0 }
  0x9d   : > { %v189_v5 = vmax.f32 %v185_v4, 0.0 }
  0x9f   : > { %191 = vst.msk [vmem:[%s156_s8] sm:$0xff] %vm190_vm2, %v189_v5 }
  0xa0   : > { %374 = shalt.err (!%p371_p5)
}
  0xa1   : > { %292 = dma.vmem_to_hbm [thread:$0]  (%p482_p4), %s207_s15, 128, %s209_s16, %s193_s18  }
  0xa4   : > { %v187_v6 = vpop.f32.mrf.mxu0 }
  0xa5 PF: > { %p298_p6 = scmp.ge.s32.totalorder %s425_s14, 2  ;;  %s220_s28 = sand.u32 1, %s405_s9  }
  0xa6   : > { %s221_s29 = scalar_lea.sflag [#allocation3], %s220_s28 }
  0xa7   : > { %p295_p7 = pnand %p298_p6, %p489_p8 }
  0xa9   : > { %p296_p9 = pneg %p295_p7 }
  0xab   : > { %400 = dma.done.wait (%p296_p9), %s221_s29, 128  }
  0xac   : > { %402 = vsyncadd (%p296_p9), %s221_s29, 4294967168  ;;  %s15_s14 = sadd.s32 1, %s425_s14   ;;  %s547_s9 = smov %s409_s10 }
  0xad   : > { %p12_p10 = scmp.ge.s32.totalorder %s15_s14, 4   ;;  %s548_s10 = smov %s413_s11 }
  0xae   : > { %s549_s11 = smov %s495_s22  ;;  %s550_s12 = smov %s421_s13 }
  0xaf   : > { %s551_s13 = smov %s553_s17  ;;  %14 = sbr.rel (!%p12_p10) target bundleno = 4 (0x4), region = 63 }
  0xb4   :  { %227 = vsyncpa [#allocation3], 1 }
  0xb5   :  { %229 = vsyncpa [#allocation3 + $0x1], 1 }

</bundles_post_ra>
